<compile_context>
chip_gen: v6e
topology: v6e:2x2x1
jax: 0.10.0
libtpu: 0.0.40
codegen_flags: <defaults>
</compile_context>

<pallas_src>
import numpy as np
import jax
import jax.numpy as jnp
from jax import lax
from jax.experimental import pallas as pl
from jax.experimental.pallas import tpu as pltpu


def _tuv_ce_kernel(y_ref, t_ref, len_ref, out_ref, acc_ref):
    # y_ref  : (7, B, Tt) f32  VMEM  per-class logit planes (time on lanes)
    # t_ref  : (3, B, Tt) i32  VMEM  per-head target planes
    # len_ref: (B, 1)     i32  VMEM  valid length per batch row (constant block)
    # out_ref: (1, 1)     f32  VMEM  scalar loss
    # acc_ref: (B, Tt)    f32  VMEM  scratch: running masked weighted-NLL sum
    tk = pl.program_id(0)
    n_tk = pl.num_programs(0)
    B, Tt = acc_ref.shape

    @pl.when(tk == 0)
    def _init():
        acc_ref[...] = jnp.zeros_like(acc_ref)

    lens = len_ref[...]                                            # (B, 1) i32

    y0, y1, y2, y3, y4, y5, y6 = (y_ref[c] for c in range(7))      # (B, Tt) each
    t_turn, t_utt, t_vad = (t_ref[c] for c in range(3))            # (B, Tt) each

    # --- turn head: 3-class CE, classes unrolled (VPU only, no XLU reduce) ---
    m = jnp.maximum(jnp.maximum(y0, y1), y2)
    lse = m + jnp.log(jnp.exp(y0 - m) + jnp.exp(y1 - m) + jnp.exp(y2 - m))
    picked = jnp.where(t_turn == 0, y0, jnp.where(t_turn == 1, y1, y2))
    nll_turn = lse - picked

    # --- 2-class heads: CE(target) == softplus(y_other - y_target) ----------
    def binary_nll(ya, yb, tgt):
        d = jnp.where(tgt == 0, yb - ya, ya - yb)      # y_other - y_target
        # numerically stable softplus; plain log keeps Mosaic lowering simple
        return jnp.maximum(d, 0.0) + jnp.log(1.0 + jnp.exp(-jnp.abs(d)))

    nll_utt = binary_nll(y3, y4, t_utt)
    nll_vad = binary_nll(y5, y6, t_vad)

    # Head weights folded in before the time reduction (same denominator L).
    weighted = 0.6 * nll_turn + 0.1 * nll_utt + 0.3 * nll_vad      # (B, Tt)

    # Mask out time steps beyond each row's valid length (also kills padding).
    t_global = lax.broadcasted_iota(jnp.int32, (B, Tt), 1) + tk * Tt
    acc_ref[...] += jnp.where(t_global < lens, weighted, 0.0)

    @pl.when(tk == n_tk - 1)
    def _finalize():
        L = jnp.maximum(lens.astype(jnp.float32), 1.0)             # (B, 1)
        per_batch = jnp.sum(acc_ref[...], axis=1, keepdims=True) / L
        valid = (lens > 0).astype(jnp.float32)                     # (B, 1)
        total = jnp.sum(per_batch * valid, axis=0, keepdims=True)  # (1, 1)
        count = jnp.sum(valid, axis=0, keepdims=True)              # (1, 1)
        out_ref[...] = jnp.where(count > 0.0,
                                 total / jnp.maximum(count, 1.0),
                                 jnp.zeros_like(total))


def turn_utterance_vad_ce_loss(y, t, y_len, *, t_tile=512):
    """y: (T, B, 7) f32 logits, t: (T, B, 3) int targets, y_len: (B,) int lengths."""
    T, B, C = y.shape
    assert C == 7 and t.shape == (T, B, 3)

    # Exactly one layout pass: class-major / time-last.
    y_cbt = jnp.transpose(y, (2, 1, 0)).astype(jnp.float32)        # (7, B, T)
    t_cbt = jnp.transpose(t, (2, 1, 0)).astype(jnp.int32)          # (3, B, T)
    # Clamp to T so the mean denominator matches the actually-sliced rows.
    lens = jnp.minimum(jnp.asarray(y_len, jnp.int32), T).reshape(B, 1)

    if T <= t_tile:
        tt, n_tiles = T, 1            # single resident block (block == full T)
    else:
        assert t_tile % 128 == 0, "time tile must be a multiple of 128"
        tt = t_tile
        t_pad = pl.cdiv(T, tt) * tt
        if t_pad != T:
            pad = ((0, 0), (0, 0), (0, t_pad - T))
            y_cbt = jnp.pad(y_cbt, pad)   # padded tail is masked out (lens <= T)
            t_cbt = jnp.pad(t_cbt, pad)
        n_tiles = t_pad // tt

    out = pl.pallas_call(
        _tuv_ce_kernel,
        out_shape=jax.ShapeDtypeStruct((1, 1), jnp.float32),
        grid=(n_tiles,),
        in_specs=[
            pl.BlockSpec((7, B, tt), lambda k: (0, 0, k)),
            pl.BlockSpec((3, B, tt), lambda k: (0, 0, k)),
            pl.BlockSpec((B, 1), lambda k: (0, 0)),
        ],
        out_specs=pl.BlockSpec((1, 1), lambda k: (0, 0)),
        scratch_shapes=[pltpu.VMEM((B, tt), jnp.float32)],
        compiler_params=pltpu.CompilerParams(
            # Time is the reduction axis (carries the accumulator scratch).
            # A "parallel" batch axis (v7x megacore) would require per-core
            # partial outputs; kept single-axis for correctness everywhere.
            dimension_semantics=("arbitrary",),
        ),
    )(y_cbt, t_cbt, lens)
    return out[0, 0]


def _reference_loss(y, t, y_len):
    """Pure-JAX mirror of the PyTorch forward (y_len are concrete ints)."""
    def ce(logits, tgt):
        logp = jax.nn.log_softmax(logits, axis=-1)
        picked = jnp.take_along_axis(logp, tgt[:, None], axis=-1)[:, 0]
        return -jnp.mean(picked)

    total = 0.0
    count = 0
    for i, L in enumerate(list(np.asarray(y_len))):
        L = int(L)
        if L == 0:
            continue
        total += 0.6 * ce(y[:L, i, 0:3], t[:L, i, 0])
        total += 0.1 * ce(y[:L, i, 3:5], t[:L, i, 1])
        total += 0.3 * ce(y[:L, i, 5:7], t[:L, i, 2])
        count += 1
    if count > 0:
        total = total / count
    return jnp.float32(total)


if __name__ == "__main__":
    T, B = 200, 4
    key = jax.random.PRNGKey(0)
    k_y, k_turn, k_utt, k_vad = jax.random.split(key, 4)

    y = jax.random.normal(k_y, (T, B, 7), dtype=jnp.float32)
    t_turn = jax.random.randint(k_turn, (T, B, 1), 0, 3, dtype=jnp.int32)
    t_utt = jax.random.randint(k_utt, (T, B, 1), 0, 2, dtype=jnp.int32)
    t_vad = jax.random.randint(k_vad, (T, B, 1), 0, 2, dtype=jnp.int32)
    t = jnp.concatenate([t_turn, t_utt, t_vad], axis=-1)           # (T, B, 3)
    y_len = np.array([200, 130, 0, 57], dtype=np.int32)            # includes a skipped (len=0) row

    ref = _reference_loss(y, t, y_len)

    # Multi-tile path (time-tiled grid + padding + accumulator).
    loss_tiled = jax.block_until_ready(
        turn_utterance_vad_ce_loss(y, t, y_len, t_tile=128))
    np.testing.assert_allclose(np.asarray(loss_tiled), np.asarray(ref),
                               rtol=1e-5, atol=1e-5)

    # Single-block path (default tile covers the full sequence).
    loss_whole = jax.block_until_ready(turn_utterance_vad_ce_loss(y, t, y_len))
    np.testing.assert_allclose(np.asarray(loss_whole), np.asarray(ref),
                               rtol=1e-5, atol=1e-5)

    print("KERNEL_OK")
</pallas_src>

<mosaic_0001>
module attributes {stable_mosaic.version = 11 : i64} {
  func.func @_tuv_ce_kernel(%arg0: i32, %arg1: memref<7x4x128xf32, #tpu.memory_space<vmem>>, %arg2: memref<3x4x128xi32, #tpu.memory_space<vmem>>, %arg3: memref<4x1xi32, #tpu.memory_space<vmem>>, %arg4: memref<1x1xf32, #tpu.memory_space<vmem>>, %arg5: memref<4x128xf32, #tpu.memory_space<vmem>>) attributes {dimension_semantics = [#tpu.dimension_semantics<arbitrary>], iteration_bounds = array<i64: 2>, scalar_prefetch = 0 : i64, scratch_operands = 1 : i64, tpu.core_type = #tpu.core_type<tc>, window_params = [{transform_indices = @transform_0, window_bounds = array<i64: 7, 4, 128>}, {transform_indices = @transform_1, window_bounds = array<i64: 3, 4, 128>}, {pipeline_mode = #tpu.pipeline_mode<synchronous>, transform_indices = @transform_2, window_bounds = array<i64: 4, 1>}, {pipeline_mode = #tpu.pipeline_mode<synchronous>, transform_indices = @transform_3, window_bounds = array<i64: 1, 1>}]} {
    %c0_i32 = arith.constant 0 : i32
    %0 = arith.cmpi eq, %arg0, %c0_i32 : i32
    %1 = arith.extui %0 : i1 to i32
    %c0_i32_0 = arith.constant 0 : i32
    %2 = arith.cmpi ne, %1, %c0_i32_0 : i32
    scf.if %2 {
      %cst_44 = arith.constant 0.000000e+00 : f32
      %95 = vector.broadcast %cst_44 : f32 to vector<4x128xf32>
      %c0_45 = arith.constant 0 : index
      %c0_46 = arith.constant 0 : index
      %96 = vector.load %arg5[%c0_45, %c0_46] : memref<4x128xf32, #tpu.memory_space<vmem>>, vector<4x128xf32>
      tpu.vector_store %arg5[%c0_45, %c0_46], %95 {strides = array<i32>} : memref<4x128xf32, #tpu.memory_space<vmem>>, vector<4x128xf32>,
    } else {
    }
    %c0 = arith.constant 0 : index
    %c0_1 = arith.constant 0 : index
    %3 = vector.load %arg3[%c0, %c0_1] : memref<4x1xi32, #tpu.memory_space<vmem>>, vector<4x1xi32>
    %c0_2 = arith.constant 0 : index
    %c0_3 = arith.constant 0 : index
    %c0_4 = arith.constant 0 : index
    %4 = vector.load %arg1[%c0_2, %c0_3, %c0_4] : memref<7x4x128xf32, #tpu.memory_space<vmem>>, vector<1x4x128xf32>
    %5 = vector.shape_cast %4 : vector<1x4x128xf32> to vector<4x128xf32>
    %c1 = arith.constant 1 : index
    %c0_5 = arith.constant 0 : index
    %c0_6 = arith.constant 0 : index
    %6 = vector.load %arg1[%c1, %c0_5, %c0_6] : memref<7x4x128xf32, #tpu.memory_space<vmem>>, vector<1x4x128xf32>
    %7 = vector.shape_cast %6 : vector<1x4x128xf32> to vector<4x128xf32>
    %c2 = arith.constant 2 : index
    %c0_7 = arith.constant 0 : index
    %c0_8 = arith.constant 0 : index
    %8 = vector.load %arg1[%c2, %c0_7, %c0_8] : memref<7x4x128xf32, #tpu.memory_space<vmem>>, vector<1x4x128xf32>
    %9 = vector.shape_cast %8 : vector<1x4x128xf32> to vector<4x128xf32>
    %c3 = arith.constant 3 : index
    %c0_9 = arith.constant 0 : index
    %c0_10 = arith.constant 0 : index
    %10 = vector.load %arg1[%c3, %c0_9, %c0_10] : memref<7x4x128xf32, #tpu.memory_space<vmem>>, vector<1x4x128xf32>
    %11 = vector.shape_cast %10 : vector<1x4x128xf32> to vector<4x128xf32>
    %c4 = arith.constant 4 : index
    %c0_11 = arith.constant 0 : index
    %c0_12 = arith.constant 0 : index
    %12 = vector.load %arg1[%c4, %c0_11, %c0_12] : memref<7x4x128xf32, #tpu.memory_space<vmem>>, vector<1x4x128xf32>
    %13 = vector.shape_cast %12 : vector<1x4x128xf32> to vector<4x128xf32>
    %c5 = arith.constant 5 : index
    %c0_13 = arith.constant 0 : index
    %c0_14 = arith.constant 0 : index
    %14 = vector.load %arg1[%c5, %c0_13, %c0_14] : memref<7x4x128xf32, #tpu.memory_space<vmem>>, vector<1x4x128xf32>
    %15 = vector.shape_cast %14 : vector<1x4x128xf32> to vector<4x128xf32>
    %c6 = arith.constant 6 : index
    %c0_15 = arith.constant 0 : index
    %c0_16 = arith.constant 0 : index
    %16 = vector.load %arg1[%c6, %c0_15, %c0_16] : memref<7x4x128xf32, #tpu.memory_space<vmem>>, vector<1x4x128xf32>
    %17 = vector.shape_cast %16 : vector<1x4x128xf32> to vector<4x128xf32>
    %c0_17 = arith.constant 0 : index
    %c0_18 = arith.constant 0 : index
    %c0_19 = arith.constant 0 : index
    %18 = vector.load %arg2[%c0_17, %c0_18, %c0_19] : memref<3x4x128xi32, #tpu.memory_space<vmem>>, vector<1x4x128xi32>
    %19 = vector.shape_cast %18 : vector<1x4x128xi32> to vector<4x128xi32>
    %c1_20 = arith.constant 1 : index
    %c0_21 = arith.constant 0 : index
    %c0_22 = arith.constant 0 : index
    %20 = vector.load %arg2[%c1_20, %c0_21, %c0_22] : memref<3x4x128xi32, #tpu.memory_space<vmem>>, vector<1x4x128xi32>
    %21 = vector.shape_cast %20 : vector<1x4x128xi32> to vector<4x128xi32>
    %c2_23 = arith.constant 2 : index
    %c0_24 = arith.constant 0 : index
    %c0_25 = arith.constant 0 : index
    %22 = vector.load %arg2[%c2_23, %c0_24, %c0_25] : memref<3x4x128xi32, #tpu.memory_space<vmem>>, vector<1x4x128xi32>
    %23 = vector.shape_cast %22 : vector<1x4x128xi32> to vector<4x128xi32>
    %24 = arith.maximumf %5, %7 : vector<4x128xf32>
    %25 = arith.maximumf %24, %9 : vector<4x128xf32>
    %26 = arith.subf %5, %25 : vector<4x128xf32>
    %27 = math.exp %26 : vector<4x128xf32>
    %28 = arith.subf %7, %25 : vector<4x128xf32>
    %29 = math.exp %28 : vector<4x128xf32>
    %30 = arith.addf %27, %29 : vector<4x128xf32>
    %31 = arith.subf %9, %25 : vector<4x128xf32>
    %32 = math.exp %31 : vector<4x128xf32>
    %33 = arith.addf %30, %32 : vector<4x128xf32>
    %34 = math.log %33 : vector<4x128xf32>
    %35 = arith.addf %25, %34 : vector<4x128xf32>
    %c0_i32_26 = arith.constant 0 : i32
    %36 = vector.broadcast %c0_i32_26 : i32 to vector<4x128xi32>
    %37 = arith.cmpi eq, %19, %36 : vector<4x128xi32>
    %c1_i32 = arith.constant 1 : i32
    %38 = vector.broadcast %c1_i32 : i32 to vector<4x128xi32>
    %39 = arith.cmpi eq, %19, %38 : vector<4x128xi32>
    %40 = arith.select %39, %7, %9 : vector<4x128xi1>, vector<4x128xf32>
    %41 = arith.select %37, %5, %40 : vector<4x128xi1>, vector<4x128xf32>
    %42 = arith.subf %35, %41 : vector<4x128xf32>
    %c0_i32_27 = arith.constant 0 : i32
    %43 = vector.broadcast %c0_i32_27 : i32 to vector<4x128xi32>
    %44 = arith.cmpi eq, %21, %43 : vector<4x128xi32>
    %45 = arith.subf %13, %11 : vector<4x128xf32>
    %46 = arith.subf %11, %13 : vector<4x128xf32>
    %47 = arith.select %44, %45, %46 : vector<4x128xi1>, vector<4x128xf32>
    %cst = arith.constant 0.000000e+00 : f32
    %48 = vector.broadcast %cst : f32 to vector<4x128xf32>
    %49 = arith.maximumf %47, %48 : vector<4x128xf32>
    %50 = math.absf %47 : vector<4x128xf32>
    %cst_28 = arith.constant 0.000000e+00 : f32
    %51 = vector.broadcast %cst_28 : f32 to vector<4x128xf32>
    %52 = arith.subf %51, %50 : vector<4x128xf32>
    %53 = math.exp %52 : vector<4x128xf32>
    %cst_29 = arith.constant 1.000000e+00 : f32
    %54 = vector.broadcast %cst_29 : f32 to vector<4x128xf32>
    %55 = arith.addf %54, %53 : vector<4x128xf32>
    %56 = math.log %55 : vector<4x128xf32>
    %57 = arith.addf %49, %56 : vector<4x128xf32>
    %c0_i32_30 = arith.constant 0 : i32
    %58 = vector.broadcast %c0_i32_30 : i32 to vector<4x128xi32>
    %59 = arith.cmpi eq, %23, %58 : vector<4x128xi32>
    %60 = arith.subf %17, %15 : vector<4x128xf32>
    %61 = arith.subf %15, %17 : vector<4x128xf32>
    %62 = arith.select %59, %60, %61 : vector<4x128xi1>, vector<4x128xf32>
    %cst_31 = arith.constant 0.000000e+00 : f32
    %63 = vector.broadcast %cst_31 : f32 to vector<4x128xf32>
    %64 = arith.maximumf %62, %63 : vector<4x128xf32>
    %65 = math.absf %62 : vector<4x128xf32>
    %cst_32 = arith.constant 0.000000e+00 : f32
    %66 = vector.broadcast %cst_32 : f32 to vector<4x128xf32>
    %67 = arith.subf %66, %65 : vector<4x128xf32>
    %68 = math.exp %67 : vector<4x128xf32>
    %cst_33 = arith.constant 1.000000e+00 : f32
    %69 = vector.broadcast %cst_33 : f32 to vector<4x128xf32>
    %70 = arith.addf %69, %68 : vector<4x128xf32>
    %71 = math.log %70 : vector<4x128xf32>
    %72 = arith.addf %64, %71 : vector<4x128xf32>
    %cst_34 = arith.constant 6.000000e-01 : f32
    %73 = vector.broadcast %cst_34 : f32 to vector<4x128xf32>
    %74 = arith.mulf %73, %42 : vector<4x128xf32>
    %cst_35 = arith.constant 1.000000e-01 : f32
    %75 = vector.broadcast %cst_35 : f32 to vector<4x128xf32>
    %76 = arith.mulf %75, %57 : vector<4x128xf32>
    %77 = arith.addf %74, %76 : vector<4x128xf32>
    %cst_36 = arith.constant 3.000000e-01 : f32
    %78 = vector.broadcast %cst_36 : f32 to vector<4x128xf32>
    %79 = arith.mulf %78, %72 : vector<4x128xf32>
    %80 = arith.addf %77, %79 : vector<4x128xf32>
    %81 = tpu.iota {dimensions = array<i32: 1>} : vector<4x128xi32>
    %c128_i32 = arith.constant 128 : i32
    %82 = arith.muli %arg0, %c128_i32 : i32
    %83 = vector.broadcast %82 : i32 to vector<4x128xi32>
    %84 = arith.addi %81, %83 : vector<4x128xi32>
    %c0_37 = arith.constant 0 : index
    %c0_38 = arith.constant 0 : index
    %85 = vector.load %arg5[%c0_37, %c0_38] : memref<4x128xf32, #tpu.memory_space<vmem>>, vector<4x128xf32>
    %86 = vector.broadcast %3 : vector<4x1xi32> to vector<4x128xi32>
    %87 = arith.cmpi slt, %84, %86 : vector<4x128xi32>
    %cst_39 = arith.constant 0.000000e+00 : f32
    %88 = vector.broadcast %cst_39 : f32 to vector<4x128xf32>
    %89 = arith.select %87, %80, %88 : vector<4x128xi1>, vector<4x128xf32>
    %90 = arith.addf %85, %89 : vector<4x128xf32>
    %c0_40 = arith.constant 0 : index
    %c0_41 = arith.constant 0 : index
    %91 = vector.load %arg5[%c0_40, %c0_41] : memref<4x128xf32, #tpu.memory_space<vmem>>, vector<4x128xf32>
    tpu.vector_store %arg5[%c0_40, %c0_41], %90 {strides = array<i32>} : memref<4x128xf32, #tpu.memory_space<vmem>>, vector<4x128xf32>,
    %c1_i32_42 = arith.constant 1 : i32
    %92 = arith.cmpi eq, %arg0, %c1_i32_42 : i32
    %93 = arith.extui %92 : i1 to i32
    %c0_i32_43 = arith.constant 0 : i32
    %94 = arith.cmpi ne, %93, %c0_i32_43 : i32
    scf.if %94 {
      %95 = arith.sitofp %3 : vector<4x1xi32> to vector<4x1xf32>
      %cst_44 = arith.constant 1.000000e+00 : f32
      %96 = vector.broadcast %cst_44 : f32 to vector<4x1xf32>
      %97 = arith.maximumf %95, %96 : vector<4x1xf32>
      %c0_45 = arith.constant 0 : index
      %c0_46 = arith.constant 0 : index
      %98 = vector.load %arg5[%c0_45, %c0_46] : memref<4x128xf32, #tpu.memory_space<vmem>>, vector<4x128xf32>
      %cst_47 = arith.constant dense<0.000000e+00> : vector<4xf32>
      %99 = vector.multi_reduction <add>, %98, %cst_47 [1] : vector<4x128xf32> to vector<4xf32>
      %100 = vector.shape_cast %99 : vector<4xf32> to vector<4x1xf32>
      %101 = arith.divf %100, %97 : vector<4x1xf32>
      %c0_i32_48 = arith.constant 0 : i32
      %102 = vector.broadcast %c0_i32_48 : i32 to vector<4x1xi32>
      %103 = arith.cmpi sgt, %3, %102 : vector<4x1xi32>
      %104 = arith.extui %103 : vector<4x1xi1> to vector<4x1xi32>
      %105 = arith.sitofp %104 : vector<4x1xi32> to vector<4x1xf32>
      %106 = arith.mulf %101, %105 : vector<4x1xf32>
      %cst_49 = arith.constant dense<0.000000e+00> : vector<1xf32>
      %107 = vector.multi_reduction <add>, %106, %cst_49 [0] : vector<4x1xf32> to vector<1xf32>
      %108 = vector.shape_cast %107 : vector<1xf32> to vector<1x1xf32>
      %cst_50 = arith.constant dense<0.000000e+00> : vector<1xf32>
      %109 = vector.multi_reduction <add>, %105, %cst_50 [0] : vector<4x1xf32> to vector<1xf32>
      %110 = vector.shape_cast %109 : vector<1xf32> to vector<1x1xf32>
      %cst_51 = arith.constant 0.000000e+00 : f32
      %111 = vector.broadcast %cst_51 : f32 to vector<1x1xf32>
      %112 = arith.cmpf ogt, %110, %111 : vector<1x1xf32>
      %cst_52 = arith.constant 1.000000e+00 : f32
      %113 = vector.broadcast %cst_52 : f32 to vector<1x1xf32>
      %114 = arith.maximumf %110, %113 : vector<1x1xf32>
      %115 = arith.divf %108, %114 : vector<1x1xf32>
      %cst_53 = arith.constant 0.000000e+00 : f32
      %116 = vector.broadcast %cst_53 : f32 to vector<1x1xf32>
      %117 = arith.select %112, %115, %116 : vector<1x1xi1>, vector<1x1xf32>
      %c0_54 = arith.constant 0 : index
      %c0_55 = arith.constant 0 : index
      %118 = vector.load %arg4[%c0_54, %c0_55] : memref<1x1xf32, #tpu.memory_space<vmem>>, vector<1x1xf32>
      tpu.vector_store %arg4[%c0_54, %c0_55], %117 {strides = array<i32>} : memref<1x1xf32, #tpu.memory_space<vmem>>, vector<1x1xf32>,
    } else {
    }
    return
  }
  func.func @transform_0(%arg0: i32) -> (i32, i32, i32) {
    %c0_i32 = arith.constant 0 : i32
    %c0_i32_0 = arith.constant 0 : i32
    %c0_i32_1 = arith.constant 0 : i32
    return %c0_i32, %c0_i32_0, %arg0 : i32, i32, i32
  }
  func.func @transform_1(%arg0: i32) -> (i32, i32, i32) {
    %c0_i32 = arith.constant 0 : i32
    %c0_i32_0 = arith.constant 0 : i32
    %c0_i32_1 = arith.constant 0 : i32
    return %c0_i32, %c0_i32_0, %arg0 : i32, i32, i32
  }
  func.func @transform_2(%arg0: i32) -> (i32, i32) {
    %c0_i32 = arith.constant 0 : i32
    %c0_i32_0 = arith.constant 0 : i32
    %c0_i32_1 = arith.constant 0 : i32
    return %c0_i32, %c0_i32_0 : i32, i32
  }
  func.func @transform_3(%arg0: i32) -> (i32, i32) {
    %c0_i32 = arith.constant 0 : i32
    %c0_i32_0 = arith.constant 0 : i32
    %c0_i32_1 = arith.constant 0 : i32
    return %c0_i32, %c0_i32_0 : i32, i32
  }
}

</mosaic_0001>

<bundles_post_ra>
// kernel: tpu_custom_call.1
= control target key start
LH: loop header
LB: loop body
LE: loop exit
PB: predicated region body
PF: predicated region fallthrough
CT: control target
= control target key end

     0   :  { %8 = vsyncpa [#allocation4], 0  ;;  %s864_s0 = inlined_call_operand.hbm [shape: f32[7,4,256], index: 0, kind: input, shape index: {}]   ;;  %s865_s1 = inlined_call_operand.hbm [shape: s32[3,4,256], index: 1, kind: input, shape index: {}]   ;;  %s866_s2 = inlined_call_operand.vmem [shape: s32[4,1], index: 2, kind: input, shape index: {}]   ;;  %s867_s3 = inlined_call_operand.hbm [shape: f32[1,1], index: 3, kind: output, shape index: {}]  }
   0x1   :  { %10 = vsyncpa [#allocation4 + $0x1], 0 }
   0x2   :  { %11 = vsyncpa [#allocation7], 0 }
   0x3   :  { %13 = vsyncpa [#allocation7 + $0x1], 0 }
   0x4   :  { %14 = vsyncpa [#allocation5], 0  ;;  %s680_s12 = smov 0   ;;  %s682_s13 = smov 0  }
   0x5   :  { %s684_s14 = smov 0   ;;  %s686_s15 = smov 0  }
   0x6 LB: > { %s699_s16 = sadd.s32 4294967295, %s649_s15   ;;  %s702_s17 = sadd.s32 1, %s649_s15   ;;  %s649_s15 = sphi %s686_s15, %s876_s15   ;;  %s645_s14 = sphi %s684_s14, %s875_s14   ;;  %s641_s13 = sphi %s682_s13, %s874_s13   ;;  %s637_s12 = sphi %s680_s12, %s873_s12  }
   0x7   : > { %s24_s18 = ssub.s32 %s649_s15, %s702_s17  ;;  %s27_s19 = sadd.s32 1, %s645_s14 }
   0x8   : > { %p25_p0 = scmp.eq.s32.totalorder %s24_s18, 0  ;;  %p34_p1 = scmp.ne.s32.totalorder %s645_s14, %s641_s13 }
   0x9   : > { %p35_p2 = scmp.eq.s32.totalorder %s649_s15, 0  ;;  %p40_p3 = scmp.ne.s32.totalorder %s641_s13, %s637_s12 }
   0xa   : > { %s712_s20 = scalar_select %p25_p0, %s645_s14, %s27_s19  }
   0xb   : > { %p36_p4 = por %p35_p2, %p34_p1  ;;  %p41_p5 = scmp.eq.s32.totalorder %s699_s16, 0 }
   0xc   : > { %p464_p6 = scmp.lt.s32.totalorder %s649_s15, 2  ;;  %s721_s22 = sand.u32 1, %s645_s14  }
   0xd   : > { %p716_p7 = por %p41_p5, %p40_p3  ;;  %s445_s23 = smul.u32 28, %s721_s22 }
   0xe   : > { %s426_s24 = sshll.u32 %s649_s15, 6  ;;  %p725_p8 = pnand %p464_p6, %p36_p4 }
   0xf   : > { %s869_s21 = scalar_select %p716_p7, 1, 0 }
  0x10   : > { %s734_s28 = scalar_lea.hbm %s864_s0, %s426_s24  ;;  %s139_s29 = scalar_lea.vmem [#allocation3], %s445_s23 }
  0x11   : > { %s145_s30 = sshll.u32 %s139_s29, 4  ;;  %s136_s4 = scalar_lea.sflag [#allocation4], %s721_s22  ;;  %s736_s30 = int_to_ptr.vmem [resolvable:$true] %s145_s30 }
  0x12   : > { %s527_s5 = scalar_lea.hbm %s734_s28, 448  ;;  %p529_p10 = pneg %p725_p8 }
  0x13   : > { %p528_p9 = scmp.ne.s32.totalorder %s734_s28, %s527_s5  ;;  %s532_s8 = scalar_lea.hbm %s864_s0, 896 }
  0x14   : > { %p533_p13 = scmp.lt.s32.totalorder %s734_s28, %s864_s0  ;;  %p534_p0 = scmp.lt.s32.totalorder %s532_s8, %s527_s5 }
  0x15   : > { %p530_p11 = pnand %p529_p10, %p528_p9 }
  0x16   : > { %p535_p1 = por %p534_p0, %p533_p13 }
  0x17   : > { %p531_p12 = pneg %p530_p11 }
  0x19   : > { %p536_p2 = pnand %p535_p1, %p531_p12 }
  0x1b   : > { %539 = shalt.err (!%p536_p2)
}
  0x1c   : > { %s540_s11 = scalar_lea.vmem %s736_s30, 448  ;;  %s651_s12 = smov [#allocation3]  }
  0x1d   : > { %p541_p3 = scmp.ne.s32.totalorder %s736_s30, %s540_s11  ;;  %s545_s18 = sshll.u32 %s651_s12, 4  ;;  %s546_s18 = int_to_ptr.vmem [resolvable:$false] %s545_s18 }
  0x1e   : > { %s547_s19 = scalar_lea.vmem %s546_s18, 896  ;;  %p548_p6 = scmp.lt.s32.totalorder %s736_s30, %s546_s18 }
  0x1f   : > { %p543_p4 = pnand %p541_p3, %p529_p10  ;;  %p549_p9 = scmp.lt.s32.totalorder %s547_s19, %s540_s11 }
  0x21   : > { %p544_p5 = pneg %p543_p4  ;;  %p550_p11 = por %p549_p9, %p548_p6 }
  0x23   : > { %p551_p13 = pnand %p550_p11, %p544_p5 }
  0x25   : > { %554 = shalt.err (!%p551_p13)
}
  0x26   : > { %s652_s23 = smov 128   ;;  %s653_s26 = smov 64  }
  0x27   : > { %s654_s27 = smov 4   ;;  %p428_p12 = scmp.ge.s32.totalorder %s649_s15, 1 }
  0x28   : > { %460 = dma.hbm_to_vmem [thread:$0]  (!%p725_p8), %s734_s28, 448, %s736_s30, %s136_s4, %s652_s23, %s653_s26, %s654_s27  }
  0x29   : > { %p173_p0 = scmp.lt.s32.totalorder %s649_s15, 3  ;;  %s446_s29 = smul.u32 12, %s721_s22 }
  0x2a   : > { %s780_s8 = scalar_lea.hbm %s865_s1, %s426_s24  ;;  %s156_s28 = scalar_lea.sflag [#allocation7], %s721_s22 }
  0x2b   : > { %p771_p1 = pnand %p428_p12, %p173_p0  ;;  %s159_s9 = scalar_lea.vmem [#allocation6], %s446_s29 }
  0x2c   : > { %s165_s10 = sshll.u32 %s159_s9, 4  ;;  %s555_s30 = scalar_lea.hbm %s780_s8, 192  ;;  %s782_s10 = int_to_ptr.vmem [resolvable:$true] %s165_s10 }
  0x2d   : > { %p556_p2 = scmp.ne.s32.totalorder %s780_s8, %s555_s30  ;;  %s560_s11 = scalar_lea.hbm %s865_s1, 384 }
  0x2e   : > { %p561_p5 = scmp.lt.s32.totalorder %s780_s8, %s865_s1  ;;  %p562_p6 = scmp.lt.s32.totalorder %s560_s11, %s555_s30 }
  0x2f   : > { %p558_p3 = pnand %p556_p2, %p529_p10 }
  0x30   : > { %p563_p9 = por %p562_p6, %p561_p5 }
  0x31   : > { %p559_p4 = pneg %p558_p3 }
  0x33   : > { %p564_p11 = pnand %p563_p9, %p559_p4 }
  0x35   : > { %567 = shalt.err (!%p564_p11)
}
  0x36   : > { %s568_s22 = scalar_lea.vmem %s782_s10, 192  ;;  %s655_s18 = smov [#allocation6]  }
  0x37   : > { %p569_p13 = scmp.ne.s32.totalorder %s782_s10, %s568_s22  ;;  %s573_s19 = sshll.u32 %s655_s18, 4  ;;  %s574_s19 = int_to_ptr.vmem [resolvable:$false] %s573_s19 }
  0x38   : > { %s575_s29 = scalar_lea.vmem %s574_s19, 384  ;;  %p576_p2 = scmp.lt.s32.totalorder %s782_s10, %s574_s19 }
  0x39   : > { %p571_p12 = pnand %p569_p13, %p529_p10  ;;  %p577_p3 = scmp.lt.s32.totalorder %s575_s29, %s568_s22 }
  0x3b   : > { %p572_p0 = pneg %p571_p12  ;;  %p578_p7 = por %p577_p3, %p576_p2 }
  0x3d   : > { %p579_p5 = pnand %p578_p7, %p572_p0 }
  0x3f   : > { %582 = shalt.err (!%p579_p5)
}
  0x40   : > { %463 = dma.hbm_to_vmem [thread:$0]  (!%p725_p8), %s780_s8, 192, %s782_s10, %s156_s28, %s652_s23, %s653_s26, %s654_s27  }
  0x41   : > { %177 = sbr.rel (%p771_p1) target bundleno = 397 (0x18d), region = 32  ;;  %s179_s6 = sand.u32 (!%p771_p1), 1, %s641_s13  }
  0x42   : > { %s447_s7 = smul.u32 (!%p771_p1), 28, %s179_s6  ;;  %s180_s9 = scalar_lea.sflag (!%p771_p1), [#allocation4], %s179_s6 }
  0x43   : > { %p872_p10 = scmp.ne.s32.totalorder (!%p771_p1), %s869_s21, 0 }
  0x44   : > { %s183_s30 = scalar_lea.vmem (!%p771_p1), [#allocation3], %s447_s7 }
  0x46   : > { %624 = dma.done.wait (%p872_p10), %s180_s9, 448  }
  0x47   : > { %626 = vsyncadd (%p872_p10), %s180_s9, 4294966848  ;;  %s448_s25 = smul.u32 12, %s179_s6  ;;  %s189_s15 = scalar_lea.sflag [#allocation7], %s179_s6 }
  0x49   : > { %s817_s4 = scalar_lea.vmem [#allocation6], %s448_s25 }
  0x4a   : > { %628 = dma.done.wait (%p872_p10), %s189_s15, 192  }
  0x4b   : > { %630 = vsyncadd (%p872_p10), %s189_s15, 4294967104  ;;  %p429_p7 = scmp.ne.s32.totalorder %s699_s16, 0 }
  0x4d   : > { %218 = sbr.rel (%p429_p7) target bundleno = 84 (0x54), region = 44 }
  0x52   : > { %v656_v0 = vmov 0.0  }
  0x53   : > { %219 = vst [vmem:[#allocation2] sm:$0xf] %v656_v0 }
  0x54 PF: > { %v827_v1 = vld [vmem:[%s866_s2] sm:$0xf]  ;;  %v657_v2 = vmov 0   ;;  %v430_v4 = vld [vmem:[%s183_s30 + $0x4] sm:$0xf]  ;;  %v291_v55 = vlaneseq  ;;  %s438_s21 = sshll.u32 %s699_s16, 7 }
  0x55   : > { %506 = vset.pattern.permute.xlu0 %v657_v2  ;;  %v221_v3 = vld [vmem:[%s183_s30] sm:$0xf]  ;;  %v431_v6 = vld [vmem:[%s183_s30 + $0x8] sm:$0xf]  ;;  %v432_v7 = vld [vmem:[%s183_s30 + $0xc] sm:$0xf]  ;;  %v294_v62 = vstv %s438_s21 }
  0x56   : > { %298 = vperm.xlu0 %506, %v827_v1   ;;  %v239_v5 = vmax.f32 %v221_v3, %v430_v4  ;;  %v433_v8 = vld [vmem:[%s183_s30 + $0x10] sm:$0xf]  ;;  %v436_v9 = vld [vmem:[%s817_s4 + $0x4] sm:$0xf]  ;;  %v434_v13 = vld [vmem:[%s183_s30 + $0x14] sm:$0xf] }
  0x57   : > { %v261_v11 = vsub.f32 %v433_v8, %v432_v7  ;;  %v262_v12 = vsub.f32 %v432_v7, %v433_v8  ;;  %v435_v14 = vld [vmem:[%s183_s30 + $0x18] sm:$0xf]  ;;  %vm260_vm0 = vcmp.eq.s32.totalorder %v436_v9, 0  ;;  %v437_v15 = vld [vmem:[%s817_s4 + $0x8] sm:$0xf]  ;;  %v292_v59 = vand.u32 127, %v291_v55 }
  0x58   : > { %v240_v10 = vmax.f32 %v239_v5, %v431_v6  ;;  %v274_v19 = vsub.f32 %v435_v14, %v434_v13  ;;  %v275_v20 = vsub.f32 %v434_v13, %v435_v14  ;;  %vm273_vm1 = vcmp.eq.s32.totalorder %v437_v15, 0  ;;  %v234_v41 = vld [vmem:[%s817_s4] sm:$0xf]  ;;  %p439_p8 = scmp.ne.s32.totalorder %s699_s16, 1 }
  0x59   : > { %v263_v18 = vsel %vm260_vm0, %v261_v11, %v262_v12  ;;  %vm256_vm2 = vcmp.eq.s32.totalorder %v234_v41, 1  ;;  %vm255_vm3 = vcmp.eq.s32.totalorder %v234_v41, 0  ;;  %v295_v63 = vadd.s32 %v294_v62, %v292_v59 }
  0x5a   : > { %v241_v16 = vsub.f32 %v221_v3, %v240_v10  ;;  %v244_v17 = vsub.f32 %v430_v4, %v240_v10  ;;  %v248_v23 = vsub.f32 %v431_v6, %v240_v10  ;;  %v265_v24 = vand.u32 2147483647, %v263_v18  ;;  %v296_v2 = vld [vmem:[#allocation2] sm:$0xf] }
  0x5b   : > { %v276_v25 = vsel %vm273_vm1, %v274_v19, %v275_v20  ;;  %v257_v45 = vsel %vm256_vm2, %v430_v4, %v431_v6  ;;  %v264_v47 = vmax.f32 %v263_v18, 0.0 }
  0x5c   : > { %v242_v21 = vmul.f32 1.442695, %v241_v16  ;;  %v245_v22 = vmul.f32 1.442695, %v244_v17  ;;  %v249_v26 = vmul.f32 1.442695, %v248_v23  ;;  %v258_v50 = vsel %vm255_vm3, %v221_v3, %v257_v45 }
  0x5d   : > { %v266_v27 = vsub.f32 0.0, %v265_v24  ;;  %v278_v28 = vand.u32 2147483647, %v276_v25  ;;  %v277_v53 = vmax.f32 %v276_v25, 0.0 }
  0x5e   : > { %507 = vpow2.f32 %v242_v21 }
  0x5f   : > { %509 = vpow2.f32 %v245_v22  ;;  %v267_v29 = vmul.f32 1.442695, %v266_v27  ;;  %v279_v30 = vsub.f32 0.0, %v278_v28 }
  0x60   : > { %511 = vpow2.f32 %v249_v26 }
  0x61   : > { %513 = vpow2.f32 %v267_v29  ;;  %v280_v31 = vmul.f32 1.442695, %v279_v30 }
  0x63   : > { %515 = vpow2.f32 %v280_v31 }
  0x6b   : > { %v508_v32 = vpop.eup %507 }
  0x6c   : > { %v510_v33 = vpop.eup %509 }
  0x6d   : > { %v247_v34 = vadd.f32 %v510_v33, %v508_v32  ;;  %v512_v35 = vpop.eup %511 }
  0x6e   : > { %v514_v37 = vpop.eup %513 }
  0x6f   : > { %v251_v36 = vadd.f32 %v512_v35, %v247_v34  ;;  %v269_v38 = vadd.f32 1.0, %v514_v37 }
  0x70   : > { %v516_v39 = vpop.eup %515 }
  0x71   : > { %517 = vlog2.f32 %v251_v36  ;;  %v282_v40 = vadd.f32 1.0, %v516_v39 }
  0x72   : > { %519 = vlog2.f32 %v269_v38 }
  0x73   : > { %521 = vlog2.f32 %v282_v40 }
  0x7e   : > { %v518_v42 = vpop.eup %517 }
  0x7f   : > { %v253_v43 = vmul.f32 0.6931472, %v518_v42  ;;  %v520_v44 = vpop.eup %519 }
  0x80   : > { %v271_v48 = vmul.f32 0.6931472, %v520_v44  ;;  %v522_v49 = vpop.eup %521 }
  0x81   : > { %v254_v46 = vadd.f32 %v253_v43, %v240_v10  ;;  %v284_v54 = vmul.f32 0.6931472, %v522_v49 }
  0x82   : > { %v272_v52 = vadd.f32 %v271_v48, %v264_v47 }
  0x83   : > { %v259_v51 = vsub.f32 %v254_v46, %v258_v50  ;;  %v285_v56 = vadd.f32 %v284_v54, %v277_v53 }
  0x84   : > { %v287_v58 = vmul.f32 0.1, %v272_v52 }
  0x85   : > { %v286_v57 = vmul.f32 0.6, %v259_v51  ;;  %v289_v61 = vmul.f32 0.3, %v285_v56 }
  0x87   : > { %v288_v60 = vadd.f32 %v287_v58, %v286_v57 }
  0x89   : > { %v290_v0 = vadd.f32 %v289_v61, %v288_v60 }
  0xd1   : > { %v299_v4 = vpop.permute.xlu0 %298 }
  0xd2   : > { %vm300_vm4 = vcmp.lt.s32.totalorder %v295_v63, %v299_v4  ;;  %307 = sbr.rel (%p439_p8) target bundleno = 382 (0x17e), region = 48 }
  0xd3   : > { %v301_v5 = vsel %vm300_vm4, %v290_v0, 0.0 }
  0xd4   : > { %v302_v3 = vadd.f32 %v301_v5, %v296_v2 }
  0xd6   : > { %303 = vst [vmem:[#allocation2] sm:$0xf] %v302_v3 }
  0xd7   : > { %vm311_vm5 = vcmask 1043456   ;;  %vm317_vm6 = vcmp.gt.s32.totalorder %v827_v1, 0  ;;  %v658_v8 = vmov 0.0   ;;  %vm321_vm7 = vcmask 3072  }
  0xd8   : > { %v440_v9 = vsel %vm317_vm6, 1.0, %v658_v8  ;;  %v308_v12 = vcvt.s32.f32 %v827_v1  ;;  %vm341_vm9 = vcmask 0  }
  0xd9   : > { %v329_v10 = vsel %vm321_vm7, %v440_v9, 0.0 }
  0xda   : > { %v330_v11 = vrot.slane %v329_v10, 4  ;;  %v309_v14 = vmax.f32 %v308_v12, 1.0 }
  0xdc   : > { %v331_v13 = vadd.f32 %v330_v11, %v329_v10  ;;  %523 = vrcp.f32 %v309_v14 }
  0xdd   : > { %v310_v6 = vld [vmem:[#allocation2] sm:$0xf] }
  0xde   : > { %v312_v7 = vsel %vm311_vm5, %v310_v6, 0.0  ;;  %v332_v15 = vrot.slane %v331_v13, 2 }
  0xdf   : > { %313 = vadd.xlane.f32.xlu0 %v312_v7 }
  0xe0   : > { %v333_v16 = vadd.f32 %v332_v15, %v331_v13 }
  0xe2   : > { %v334_v17 = vrot.slane %v333_v16, 1 }
  0xe4   : > { %v335_v18 = vadd.f32 %v334_v17, %v333_v16 }
  0xe6   : > { %v337_v20 = vmax.f32 %v335_v18, 1.0  ;;  %vm336_vm8 = vcmp.gt.f32.partialorder %v335_v18, 0.0 }
  0xe8   : > { %525 = vrcp.f32 %v337_v20 }
  0xe9   : > { %v524_v19 = vpop.eup %523 }
  0xf5   : > { %v526_v29 = vpop.eup %525 }
 0x168   : > { %v314_v21 = vpop.xlane.xlu0 %313 }
 0x169   : > { %v316_v22 = vmul.f32 %v524_v19, %v314_v21 }
 0x16b   : > { %v320_v23 = vmul.f32 %v440_v9, %v316_v22 }
 0x16d   : > { %v322_v24 = vsel %vm321_vm7, %v320_v23, 0.0 }
 0x16e   : > { %v323_v25 = vrot.slane %v322_v24, 4 }
 0x170   : > { %v324_v26 = vadd.f32 %v323_v25, %v322_v24 }
 0x172   : > { %v325_v27 = vrot.slane %v324_v26, 2 }
 0x174   : > { %v326_v28 = vadd.f32 %v325_v27, %v324_v26 }
 0x176   : > { %v327_v1 = vrot.slane %v326_v28, 1 }
 0x178   : > { %v328_v30 = vadd.f32 %v327_v1, %v326_v28 }
 0x17a   : > { %v339_v31 = vmul.f32 %v526_v29, %v328_v30 }
 0x17c   : > { %v340_v32 = vsel %vm336_vm8, %v339_v31, 0.0 }
 0x17d   : > { %342 = vst.msk [vmem:[#allocation8] sm:$0x1] %vm341_vm9, %v340_v32 }
 0x17e PF: > { %p465_p1 = scmp.eq.s32.totalorder %s699_s16, 1  ;;  %s659_s27 = smov [#allocation8]  }
 0x17f   : > { %s350_s5 = sshll.u32 %s659_s27, 4  ;;  %s351_s5 = int_to_ptr.vmem [resolvable:$true] %s350_s5 }
 0x180   : > { %s583_s8 = scalar_lea.vmem %s351_s5, 16  ;;  %s589_s10 = scalar_lea.vmem %s351_s5, 32 }
 0x181   : > { %p584_p4 = scmp.ne.s32.totalorder %s351_s5, %s583_s8  ;;  %p590_p11 = scmp.lt.s32.totalorder %s351_s5, %s351_s5 }
 0x182   : > { %p591_p13 = scmp.lt.s32.totalorder %s589_s10, %s583_s8 }
 0x183   : > { %p585_p6 = pnand %p584_p4, %p465_p1 }
 0x184   : > { %p592_p12 = por %p591_p13, %p590_p11 }
 0x185   : > { %p586_p9 = pneg %p585_p6 }
 0x187   : > { %p593_p0 = pnand %p592_p12, %p586_p9 }
 0x189   : > { %596 = shalt.err (!%p593_p0)
}
 0x18a   : > { %454 = dma.vmem_to_hbm [thread:$0]  (%p465_p1), %s351_s5, 16, %s867_s3, [#allocation5]  }
 0x18b   : > { %632 = dma.done.wait (%p465_p1), [#allocation5], 16  }
 0x18c   : > { %634 = vsyncadd (%p465_p1), [#allocation5], 4294967280 }
 0x18d PF: > { %p17_p2 = scmp.ge.s32.totalorder %s702_s17, 4   ;;  %s873_s12 = smov %s641_s13 }
 0x18e   : > { %s874_s13 = smov %s645_s14  ;;  %s875_s14 = smov %s712_s20 }
 0x18f   : > { %s876_s15 = smov %s702_s17  ;;  %19 = sbr.rel (!%p17_p2) target bundleno = 6 (0x6), region = 98 }
 0x194   :  { %363 = vsyncpa [#allocation4], 1 }
 0x195   :  { %365 = vsyncpa [#allocation4 + $0x1], 1 }
 0x196   :  { %366 = vsyncpa [#allocation7], 1 }
 0x197   :  { %368 = vsyncpa [#allocation7 + $0x1], 1 }
 0x198   :  { %369 = vsyncpa [#allocation5], 1 }
 0x199   :  { %371 = vsyncpa [#allocation5 + $0x1], 1 }

</bundles_post_ra>
